<compile_context>
chip_gen: v7x
topology: tpu7x:2x2x1
jax: 0.10.0
libtpu: 0.0.40
codegen_flags: <defaults>
</compile_context>

<pallas_src>
import functools

import jax
import jax.numpy as jnp
from jax.experimental import pallas as pl
from jax.experimental.pallas import tpu as pltpu


_VMEM_BUDGET_BYTES = 32 << 20      # working-set target (fits v7x 64 MiB with headroom)
_VMEM_LIMIT_BYTES = 64 * 1024 * 1024
_NEG_INF = -1.0e12                 # matches the module's -1e12 fill


def _round_up(x, m):
    return ((x + m - 1) // m) * m


def _gat_kernel(x_ref, bias_ref, w_ref, wa_ref, out_ref,
                h_sc, s1_sc, s2_sc, *, alpha, concat, tq):
    # x_ref:    (Bt, N, C_in)   bf16, full node axis (constant across row tiles)
    # bias_ref: (Tq, N)         bf16 additive adjacency bias (0 / -1e12)
    # w_ref:    (C_in, C_pad)   bf16, lane-padded weight        (single-buffered)
    # wa_ref:   (C_in, 2)       bf16, W @ [a1 | a2]             (single-buffered)
    # out_ref:  (Bt, Tq, C_pad) bf16
    # h_sc:     (Bt, N, C_pad)  bf16 scratch   (resident across row tiles)
    # s1_sc:    (Bt, N, 1)      f32 scratch    (query-side pre-logits)
    # s2_sc:    (Bt, 1, N)      f32 scratch    (key-side pre-logits, lane-oriented)
    r = pl.program_id(1)
    Bt, N, C_in = x_ref.shape
    C_pad = w_ref.shape[1]

    @pl.when(r == 0)
    def _():
        # Computed once per batch block; reused by every query-row tile.
        # N is padded to a multiple of 16 in the wrapper, so this leading-dim
        # merge is a free relayout (no VMEM copy).
        x2 = x_ref[...].reshape(Bt * N, C_in)                       # bf16
        h2 = jnp.dot(x2, w_ref[...], preferred_element_type=jnp.float32)
        h_sc[...] = h2.reshape(Bt, N, C_pad).astype(jnp.bfloat16)   # (Bt,N,C_pad)
        s = jnp.dot(x2, wa_ref[...], preferred_element_type=jnp.float32)
        s = s.reshape(Bt, N, 2)
        s1_sc[...] = s[..., 0:1]                                    # (Bt, N, 1)
        # One tiny XLU transpose per batch block: key-side logits onto lanes.
        s2_sc[...] = jnp.swapaxes(s[..., 1:2], 1, 2)                # (Bt, 1, N)

    row0 = pl.multiple_of(r * tq, tq)
    s1 = s1_sc[:, pl.ds(row0, tq), :]                               # (Bt, Tq, 1)

    # e[b, i, j] = s1[b, i] + s2[b, j]  (pure broadcast add, no MXU pass).
    e = s1 + s2_sc[...]                                             # (Bt, Tq, N)

    # LeakyReLU(alpha): max(e, alpha*e) is exact for 0 <= alpha <= 1.
    if 0.0 <= alpha <= 1.0:
        e = jnp.maximum(e, alpha * e)
    else:
        e = jnp.where(e > 0, e, alpha * e)

    # Adjacency mask as an additive bias (0 for edges, -1e12 otherwise).
    # Note: softmax elementwise math kept f32 (v5e has no bf16 VPU/EUP).
    logits = e + bias_ref[...].astype(jnp.float32)[None]            # (Bt, Tq, N)
    m = jnp.max(logits, axis=-1, keepdims=True)
    p = jnp.exp(logits - m)
    denom = jnp.sum(p, axis=-1, keepdims=True)
    attention = p * pl.reciprocal(denom, approx=True)

    # TODO(synk): attention dropout omitted (inference mode).

    # h_prime = attention @ h  (bf16 MXU inputs, f32 accumulation).
    h_prime = jnp.einsum("bij,bjf->bif",
                         attention.astype(jnp.bfloat16), h_sc[...],
                         preferred_element_type=jnp.float32)        # (Bt, Tq, C_pad)
    if concat:
        h_prime = jnp.maximum(h_prime, 0.0)                         # F.relu
    out_ref[...] = h_prime.astype(out_ref.dtype)


@functools.partial(jax.jit, static_argnames=("alpha", "concat"))
def gat_forward(inp, adj, W, a, *, alpha=0.2, concat=True):
    """inp: (B, N, C_in) f32, adj: (N, N) f32, W: (C_in, C_out), a: (2*C_out, 1)."""
    B, N, C_in = inp.shape
    C_out = W.shape[1]
    C_pad = _round_up(C_out, 128)           # lane-dense MXU / stores

    # Query-row tiling: full N for small graphs, 256-row slabs otherwise.
    # N padded to a multiple of 16 so bf16 sublane packing / reshapes are
    # tile-aligned on every generation.
    N16 = _round_up(max(N, 16), 16)
    Tq = N16 if N16 <= 256 else 256
    N_pad = _round_up(N16, Tq)

    # ---- Bt from a VMEM budget (rough live-bytes model per batch element). ----
    per_b = (
        2 * 2 * N_pad * C_in      # x block (bf16), double-buffered
        + 2 * N_pad * C_pad       # h scratch (bf16), resident
        + 4 * 128 * N_pad         # s1 scratch (f32, lane dim padded to 128)
        + 4 * 8 * N_pad           # s2 scratch (f32, sublane dim padded to 8)
        + 18 * Tq * N_pad         # ~4 f32 + 1 bf16 live copies of softmax slab
        + 2 * 2 * Tq * C_pad      # out block (bf16), double-buffered
    )
    fixed = (
        2 * 2 * Tq * N_pad        # bias block (bf16), double-buffered
        + 2 * C_in * (C_pad + 2)  # W + Wa (bf16), single-buffered
    )
    Bt = max(1, (_VMEM_BUDGET_BYTES - fixed) // per_b)
    if B >= 2:
        Bt = min(Bt, B // 2)      # >= 2 batch grid steps: both v7x TCs get work
    Bt = max(1, min(Bt, B))
    B_pad = _round_up(B, Bt)

    # ---- Parameter / input prep (fused into this jit, no extra HBM passes). ----
    # Fold the attention vector through W: Wa[:, 0] pairs with h_i, [:, 1] with h_j.
    a_mat = jnp.concatenate([a[:C_out, :], a[C_out:, :]], axis=1)    # (C_out, 2)
    Wa = jnp.dot(W, a_mat)                                           # (C_in, 2)
    W_p = W if C_pad == C_out else jnp.pad(W, ((0, 0), (0, C_pad - C_out)))
    W_p = W_p.astype(jnp.bfloat16)
    Wa = Wa.astype(jnp.bfloat16)

    x = inp
    if (B_pad, N_pad) != (B, N):
        x = jnp.pad(x, ((0, B_pad - B), (0, N_pad - N), (0, 0)))
    x = x.astype(jnp.bfloat16)

    # Additive adjacency bias: 0 where adj > 0, -1e12 otherwise; padded rows /
    # columns get -1e12 so padded nodes receive ~zero attention weight.
    bias = jnp.where(adj > 0, 0.0, _NEG_INF).astype(jnp.float32)
    if N_pad != N:
        bias = jnp.pad(bias, ((0, N_pad - N), (0, N_pad - N)),
                       constant_values=_NEG_INF)
    bias = bias.astype(jnp.bfloat16)

    kernel = functools.partial(_gat_kernel, alpha=float(alpha),
                               concat=bool(concat), tq=Tq)

    flops = (2 * B_pad * N_pad * C_in * (C_pad + 2)
             + 2 * B_pad * N_pad * N_pad * C_pad
             + 8 * B_pad * N_pad * N_pad)
    bytes_accessed = (2 * B_pad * N_pad * C_in + 2 * N_pad * N_pad
                      + 2 * C_in * (C_pad + 2) + 2 * B_pad * N_pad * C_pad)

    out = pl.pallas_call(
        kernel,
        out_shape=jax.ShapeDtypeStruct((B_pad, N_pad, C_pad), jnp.bfloat16),
        grid_spec=pltpu.PrefetchScalarGridSpec(
            num_scalar_prefetch=0,
            grid=(B_pad // Bt, N_pad // Tq),
            in_specs=[
                pl.BlockSpec((Bt, N_pad, C_in), lambda b, r: (b, 0, 0)),
                pl.BlockSpec((Tq, N_pad), lambda b, r: (r, 0)),
                pl.BlockSpec((C_in, C_pad), lambda b, r: (0, 0),
                             pipeline_mode=pl.Buffered(1)),
                pl.BlockSpec((C_in, 2), lambda b, r: (0, 0),
                             pipeline_mode=pl.Buffered(1)),
            ],
            out_specs=pl.BlockSpec((Bt, Tq, C_pad), lambda b, r: (b, r, 0)),
            scratch_shapes=[
                pltpu.VMEM((Bt, N_pad, C_pad), jnp.bfloat16),   # h
                pltpu.VMEM((Bt, N_pad, 1), jnp.float32),        # s1 (query logits)
                pltpu.VMEM((Bt, 1, N_pad), jnp.float32),        # s2 (key logits)
            ],
        ),
        compiler_params=pltpu.CompilerParams(
            dimension_semantics=("parallel", "arbitrary"),
            vmem_limit_bytes=_VMEM_LIMIT_BYTES,
        ),
        cost_estimate=pl.CostEstimate(
            flops=flops,
            transcendentals=B_pad * N_pad * N_pad,
            bytes_accessed=bytes_accessed,
        ),
    )(x, bias, W_p, Wa)

    # Undo batch / node / lane padding; cast back to the input dtype.
    return out[:B, :N, :C_out].astype(inp.dtype)


def _xavier_uniform(key, shape, gain):
    fan_in, fan_out = shape[0], shape[1]
    bound = gain * jnp.sqrt(6.0 / (fan_in + fan_out))
    return jax.random.uniform(key, shape, jnp.float32, minval=-bound, maxval=bound)


if __name__ == "__main__":
    # Small shapes consistent with the module: batch=2, nodes N=8,
    # in_features=16, out_features=32.
    B, N, C_in, C_out = 2, 8, 16, 32
    alpha = 0.2

    key = jax.random.PRNGKey(0)
    k_x, k_adj, k_w, k_a = jax.random.split(key, 4)

    # Deterministic parameter init mirroring nn.init.xavier_uniform_(gain=1.414).
    W = _xavier_uniform(k_w, (C_in, C_out), gain=1.414)
    a = _xavier_uniform(k_a, (2 * C_out, 1), gain=1.414)

    # Inputs.
    x = jax.random.normal(k_x, (B, N, C_in), dtype=jnp.float32)
    adj = (jax.random.uniform(k_adj, (N, N)) > 0.5).astype(jnp.float32)
    # Ensure self-loops so every row has at least one valid neighbor.
    adj = jnp.maximum(adj, jnp.eye(N, dtype=jnp.float32))

    out = gat_forward(x, adj, W, a, alpha=alpha, concat=True)
    jax.block_until_ready(out)
    assert out.shape == (B, N, C_out), out.shape

    # Pure-JAX reference (same math as the PyTorch forward, eval mode, f32).
    h = jnp.einsum("bnc,cf->bnf", x, W)
    s1 = jnp.einsum("bnf,f->bn", h, a[:C_out, 0])
    s2 = jnp.einsum("bnf,f->bn", h, a[C_out:, 0])
    e = s1[:, :, None] + s2[:, None, :]                       # (B, N, N)
    e = jnp.where(e > 0, e, alpha * e)
    logits = jnp.where(adj[None] > 0, e, -1.0e12)
    att = jax.nn.softmax(logits, axis=-1)
    ref = jnp.maximum(jnp.einsum("bij,bjf->bif", att, h), 0.0)

    # Tolerance accounts for bf16 MXU inputs/output + approx reciprocal.
    max_diff = float(jnp.max(jnp.abs(out - ref)))
    assert jnp.allclose(out, ref, atol=5e-2, rtol=5e-2), (
        f"mismatch vs reference: max abs diff = {max_diff}")

    print("KERNEL_OK")
</pallas_src>

<mosaic_0001>
module attributes {stable_mosaic.version = 11 : i64} {
  func.func @_gat_kernel(%arg0: i32, %arg1: i32, %arg2: memref<1x16x16xbf16, #tpu.memory_space<vmem>>, %arg3: memref<16x16xbf16, #tpu.memory_space<vmem>>, %arg4: memref<16x128xbf16, #tpu.memory_space<vmem>>, %arg5: memref<16x2xbf16, #tpu.memory_space<vmem>>, %arg6: memref<1x16x128xbf16, #tpu.memory_space<vmem>>, %arg7: memref<1x16x128xbf16, #tpu.memory_space<vmem>>, %arg8: memref<1x16x1xf32, #tpu.memory_space<vmem>>, %arg9: memref<1x1x16xf32, #tpu.memory_space<vmem>>) attributes {dimension_semantics = [#tpu.dimension_semantics<parallel>, #tpu.dimension_semantics<arbitrary>], iteration_bounds = array<i64: 2, 1>, scalar_prefetch = 0 : i64, scratch_operands = 3 : i64, tpu.core_type = #tpu.core_type<tc>, window_params = [{transform_indices = @transform_0, window_bounds = array<i64: 1, 16, 16>}, {transform_indices = @transform_1, window_bounds = array<i64: 16, 16>}, {pipeline_mode = #tpu.pipeline_mode<synchronous>, transform_indices = @transform_2, window_bounds = array<i64: 16, 128>}, {pipeline_mode = #tpu.pipeline_mode<synchronous>, transform_indices = @transform_3, window_bounds = array<i64: 16, 2>}, {transform_indices = @transform_4, window_bounds = array<i64: 1, 16, 128>}]} {
    %c0_i32 = arith.constant 0 : i32
    %0 = arith.cmpi eq, %arg1, %c0_i32 : i32
    %1 = arith.extui %0 : i1 to i32
    %c0_i32_0 = arith.constant 0 : i32
    %2 = arith.cmpi ne, %1, %c0_i32_0 : i32
    scf.if %2 {
      %c0_17 = arith.constant 0 : index
      %c0_18 = arith.constant 0 : index
      %c0_19 = arith.constant 0 : index
      %35 = vector.load %arg2[%c0_17, %c0_18, %c0_19] : memref<1x16x16xbf16, #tpu.memory_space<vmem>>, vector<1x16x16xbf16>
      %36 = vector.shape_cast %35 : vector<1x16x16xbf16> to vector<16x16xbf16>
      %c0_20 = arith.constant 0 : index
      %c0_21 = arith.constant 0 : index
      %37 = vector.load %arg4[%c0_20, %c0_21] : memref<16x128xbf16, #tpu.memory_space<vmem>>, vector<16x128xbf16>
      %cst_22 = arith.constant dense<0.000000e+00> : vector<16x128xf32>
      %38 = tpu.matmul %36, %37, %cst_22 {dimension_numbers = #tpu.dot_dimension_numbers<[1], [0], [0], [1], [0, 0, 1, 1], [], []>} : vector<16x16xbf16>, vector<16x128xbf16>, vector<16x128xf32> -> vector<16x128xf32>
      %39 = vector.shape_cast %38 : vector<16x128xf32> to vector<1x16x128xf32>
      %40 = arith.truncf %39 : vector<1x16x128xf32> to vector<1x16x128xbf16>
      %c0_23 = arith.constant 0 : index
      %c0_24 = arith.constant 0 : index
      %c0_25 = arith.constant 0 : index
      %41 = vector.load %arg7[%c0_23, %c0_24, %c0_25] : memref<1x16x128xbf16, #tpu.memory_space<vmem>>, vector<1x16x128xbf16>
      tpu.vector_store %arg7[%c0_23, %c0_24, %c0_25], %40 {strides = array<i32>} : memref<1x16x128xbf16, #tpu.memory_space<vmem>>, vector<1x16x128xbf16>,
      %c0_26 = arith.constant 0 : index
      %c0_27 = arith.constant 0 : index
      %42 = vector.load %arg5[%c0_26, %c0_27] : memref<16x2xbf16, #tpu.memory_space<vmem>>, vector<16x2xbf16>
      %cst_28 = arith.constant dense<0.000000e+00> : vector<16x2xf32>
      %43 = tpu.matmul %36, %42, %cst_28 {dimension_numbers = #tpu.dot_dimension_numbers<[1], [0], [0], [1], [0, 0, 1, 1], [], []>} : vector<16x16xbf16>, vector<16x2xbf16>, vector<16x2xf32> -> vector<16x2xf32>
      %44 = vector.shape_cast %43 : vector<16x2xf32> to vector<1x16x2xf32>
      %45 = vector.extract_strided_slice %44 {offsets = [0, 0, 0], sizes = [1, 16, 1], strides = [1, 1, 1]} : vector<1x16x2xf32> to vector<1x16x1xf32>
      %c0_29 = arith.constant 0 : index
      %c0_30 = arith.constant 0 : index
      %c0_31 = arith.constant 0 : index
      %46 = vector.load %arg8[%c0_29, %c0_30, %c0_31] : memref<1x16x1xf32, #tpu.memory_space<vmem>>, vector<1x16x1xf32>
      tpu.vector_store %arg8[%c0_29, %c0_30, %c0_31], %45 {strides = array<i32>} : memref<1x16x1xf32, #tpu.memory_space<vmem>>, vector<1x16x1xf32>,
      %47 = vector.extract_strided_slice %44 {offsets = [0, 0, 1], sizes = [1, 16, 1], strides = [1, 1, 1]} : vector<1x16x2xf32> to vector<1x16x1xf32>
      %48 = tpu.transpose %47, [0, 2, 1] : vector<1x16x1xf32> -> vector<1x1x16xf32>
      %c0_32 = arith.constant 0 : index
      %c0_33 = arith.constant 0 : index
      %c0_34 = arith.constant 0 : index
      %49 = vector.load %arg9[%c0_32, %c0_33, %c0_34] : memref<1x1x16xf32, #tpu.memory_space<vmem>>, vector<1x1x16xf32>
      tpu.vector_store %arg9[%c0_32, %c0_33, %c0_34], %48 {strides = array<i32>} : memref<1x1x16xf32, #tpu.memory_space<vmem>>, vector<1x1x16xf32>,
    } else {
    }
    %c16_i32 = arith.constant 16 : i32
    %3 = arith.muli %arg1, %c16_i32 : i32
    %4 = tpu.assume_multiple %3, 16 : i32
    %c0 = arith.constant 0 : index
    %5 = arith.index_cast %4 : i32 to index
    %c0_1 = arith.constant 0 : index
    %6 = vector.load %arg8[%c0, %5, %c0_1] : memref<1x16x1xf32, #tpu.memory_space<vmem>>, vector<1x16x1xf32>
    %c0_2 = arith.constant 0 : index
    %c0_3 = arith.constant 0 : index
    %c0_4 = arith.constant 0 : index
    %7 = vector.load %arg9[%c0_2, %c0_3, %c0_4] : memref<1x1x16xf32, #tpu.memory_space<vmem>>, vector<1x1x16xf32>
    %8 = vector.broadcast %6 : vector<1x16x1xf32> to vector<1x16x16xf32>
    %9 = vector.broadcast %7 : vector<1x1x16xf32> to vector<1x16x16xf32>
    %10 = arith.addf %8, %9 : vector<1x16x16xf32>
    %cst = arith.constant 2.000000e-01 : f32
    %11 = vector.broadcast %cst : f32 to vector<1x16x16xf32>
    %12 = arith.mulf %11, %10 : vector<1x16x16xf32>
    %13 = arith.maximumf %10, %12 : vector<1x16x16xf32>
    %c0_5 = arith.constant 0 : index
    %c0_6 = arith.constant 0 : index
    %14 = vector.load %arg3[%c0_5, %c0_6] : memref<16x16xbf16, #tpu.memory_space<vmem>>, vector<16x16xbf16>
    %15 = arith.extf %14 : vector<16x16xbf16> to vector<16x16xf32>
    %16 = vector.shape_cast %15 : vector<16x16xf32> to vector<1x16x16xf32>
    %17 = arith.addf %13, %16 : vector<1x16x16xf32>
    %cst_7 = arith.constant dense<0xFF800000> : vector<1x16xf32>
    %18 = vector.multi_reduction <maximumf>, %17, %cst_7 [2] : vector<1x16x16xf32> to vector<1x16xf32>
    %19 = vector.shape_cast %18 : vector<1x16xf32> to vector<1x16x1xf32>
    %20 = vector.broadcast %19 : vector<1x16x1xf32> to vector<1x16x16xf32>
    %21 = arith.subf %17, %20 : vector<1x16x16xf32>
    %22 = math.exp %21 : vector<1x16x16xf32>
    %cst_8 = arith.constant dense<0.000000e+00> : vector<1x16xf32>
    %23 = vector.multi_reduction <add>, %22, %cst_8 [2] : vector<1x16x16xf32> to vector<1x16xf32>
    %24 = vector.shape_cast %23 : vector<1x16xf32> to vector<1x16x1xf32>
    %25 = tpu.reciprocal %24 {approx = true} : vector<1x16x1xf32> -> vector<1x16x1xf32>
    %26 = vector.broadcast %25 : vector<1x16x1xf32> to vector<1x16x16xf32>
    %27 = arith.mulf %22, %26 : vector<1x16x16xf32>
    %28 = arith.truncf %27 : vector<1x16x16xf32> to vector<1x16x16xbf16>
    %c0_9 = arith.constant 0 : index
    %c0_10 = arith.constant 0 : index
    %c0_11 = arith.constant 0 : index
    %29 = vector.load %arg7[%c0_9, %c0_10, %c0_11] : memref<1x16x128xbf16, #tpu.memory_space<vmem>>, vector<1x16x128xbf16>
    "tpu.trace_start"() <{level = 10 : i32, message = "bij,bjf->bif"}> : () -> ()
    %cst_12 = arith.constant dense<0.000000e+00> : vector<1x16x128xf32>
    %30 = tpu.matmul %28, %29, %cst_12 {dimension_numbers = #tpu.dot_dimension_numbers<[2], [1], [1], [2], [0, 0, 0, 1, 1, 2], [0], [0]>} : vector<1x16x16xbf16>, vector<1x16x128xbf16>, vector<1x16x128xf32> -> vector<1x16x128xf32>
    "tpu.trace_stop"() : () -> ()
    %cst_13 = arith.constant 0.000000e+00 : f32
    %31 = vector.broadcast %cst_13 : f32 to vector<1x16x128xf32>
    %32 = arith.maximumf %30, %31 : vector<1x16x128xf32>
    %33 = arith.truncf %32 : vector<1x16x128xf32> to vector<1x16x128xbf16>
    %c0_14 = arith.constant 0 : index
    %c0_15 = arith.constant 0 : index
    %c0_16 = arith.constant 0 : index
    %34 = vector.load %arg6[%c0_14, %c0_15, %c0_16] : memref<1x16x128xbf16, #tpu.memory_space<vmem>>, vector<1x16x128xbf16>
    tpu.vector_store %arg6[%c0_14, %c0_15, %c0_16], %33 {strides = array<i32>} : memref<1x16x128xbf16, #tpu.memory_space<vmem>>, vector<1x16x128xbf16>,
    return
  }
  func.func @transform_0(%arg0: i32, %arg1: i32) -> (i32, i32, i32) {
    %c0_i32 = arith.constant 0 : i32
    %c0_i32_0 = arith.constant 0 : i32
    %c0_i32_1 = arith.constant 0 : i32
    return %arg0, %c0_i32, %c0_i32_0 : i32, i32, i32
  }
  func.func @transform_1(%arg0: i32, %arg1: i32) -> (i32, i32) {
    %c0_i32 = arith.constant 0 : i32
    %c0_i32_0 = arith.constant 0 : i32
    return %arg1, %c0_i32 : i32, i32
  }
  func.func @transform_2(%arg0: i32, %arg1: i32) -> (i32, i32) {
    %c0_i32 = arith.constant 0 : i32
    %c0_i32_0 = arith.constant 0 : i32
    %c0_i32_1 = arith.constant 0 : i32
    return %c0_i32, %c0_i32_0 : i32, i32
  }
  func.func @transform_3(%arg0: i32, %arg1: i32) -> (i32, i32) {
    %c0_i32 = arith.constant 0 : i32
    %c0_i32_0 = arith.constant 0 : i32
    %c0_i32_1 = arith.constant 0 : i32
    return %c0_i32, %c0_i32_0 : i32, i32
  }
  func.func @transform_4(%arg0: i32, %arg1: i32) -> (i32, i32, i32) {
    %c0_i32 = arith.constant 0 : i32
    %c0_i32_0 = arith.constant 0 : i32
    return %arg0, %arg1, %c0_i32 : i32, i32, i32
  }
}

</mosaic_0001>

<bundles_post_ra>
// kernel: gat_forward.1
= control target key start
LH: loop header
LB: loop body
LE: loop exit
PB: predicated region body
PF: predicated region fallthrough
CT: control target
= control target key end

     0   :  { %9 = vsyncpa [#allocation6], 0  ;;  %s1423_s0 = inlined_call_operand.hbm [shape: bf16[2,16,16], index: 0, kind: input, shape index: {}]   ;;  %s1424_s1 = inlined_call_operand.hbm [shape: bf16[16,16], index: 1, kind: input, shape index: {}]   ;;  %s1425_s2 = inlined_call_operand.hbm [shape: bf16[16,128], index: 2, kind: input, shape index: {}]   ;;  %s1426_s3 = inlined_call_operand.hbm [shape: bf16[16,2], index: 3, kind: input, shape index: {}]   ;;  %s1427_s4 = inlined_call_operand.hbm [shape: bf16[2,16,128], index: 4, kind: output, shape index: {}]  }
   0x1   :  { %11 = vsyncpa [#allocation6 + $0x1], 0 }
   0x2   :  { %12 = vsyncpa [#allocation9], 0 }
   0x3   :  { %13 = vsyncpa [#allocation12], 0 }
   0x4   :  { %14 = vsyncpa [#allocation7], 0 }
   0x5   :  { %16 = vsyncpa [#allocation7 + $0x1], 0  ;;  %s1117_s15 = smov 0   ;;  %s1119_s16 = smov 0  }
   0x6   :  { %s1121_s17 = smov 0   ;;  %s1123_s18 = smov 0  }
   0x7   :  { %s1125_s19 = smov 0   ;;  %s1127_s20 = smov 0  }
   0x8 LB: > { %s692_s21 = sadd.s32 4294967295, %s1077_s20   ;;  %s693_s22 = sadd.s32 4294967294, %s1077_s20   ;;  %s1077_s20 = sphi %s1127_s20, %s22_s20   ;;  %s1073_s19 = sphi %s1125_s19, %s1454_s19   ;;  %s1069_s18 = sphi %s1123_s18, %s1453_s18   ;;  %s1065_s17 = sphi %s1121_s17, %s1452_s17   ;;  %s1061_s16 = sphi %s1119_s16, %s1451_s16   ;;  %s1057_s15 = sphi %s1117_s15, %s1450_s15  }
   0x9   : > { %p54_p0 = scmp.ne.s32.totalorder %s1061_s16, %s1057_s15  ;;  %p1151_p1 = scmp.eq.s32.totalorder %s692_s21, 0 }
   0xa   : > { %p1155_p2 = scmp.eq.s32.totalorder %s692_s21, 1  ;;  %p154_p3 = scmp.eq.s32.totalorder %s693_s22, 1 }
   0xb   : > { %s1433_s23 = scalar_select %p1151_p1, 1, 0 }
   0xc   : > { %s1434_s24 = scalar_select %p1155_p2, 1, 0 }
   0xd   : > { %p1161_p4 = por %p1151_p1, %p54_p0  ;;  %p694_p5 = scmp.ge.s32.totalorder %s1077_s20, 1 }
   0xe   : > { %p1166_p6 = por %p154_p3, %p54_p0  ;;  %p161_p7 = scmp.lt.s32.totalorder %s1077_s20, 3 }
   0xf   : > { %s1435_s25 = scalar_select %p1161_p4, 1, 0 }
  0x10   : > { %s1436_s26 = scalar_select %p1166_p6, 1, 0 }
  0x11   : > { %p1171_p8 = pnand %p694_p5, %p161_p7  ;;  %s1079_s28 = smov [#allocation8]  }
  0x12   : > { %1437 = sst [smem:[#allocation18_spill]] %s1436_s26  ;;  %s176_s29 = sshll.u32 %s1079_s28, 4  ;;  %s1175_s29 = int_to_ptr.vmem [resolvable:$true] %s176_s29 }
  0x13   : > { %s1438_s27 = scalar_select %p1171_p8, 1, 0 }
  0x14   : > { %p775_p9 = pneg %p1171_p8  ;;  %s1080_s5 = smov [#allocation10]  }
  0x15   : > { %s189_s6 = sshll.u32 %s1080_s5, 4  ;;  %s1081_s7 = smov [#allocation11]   ;;  %s1186_s6 = int_to_ptr.vmem [resolvable:$true] %s189_s6 }
  0x16   : > { %p1182_p11 = pnand %p775_p9, %p1151_p1  ;;  %s1188_s8 = sshll.u32 %s1081_s7, 4  ;;  %s203_s8 = int_to_ptr.vmem [resolvable:$true] %s1188_s8 }
  0x17   : > { %s873_s11 = scalar_lea.hbm %s1424_s1, 128 }
  0x18   : > { %p874_p12 = scmp.ne.s32.totalorder %s1424_s1, %s873_s11  ;;  %p1198_p13 = pneg %p1182_p11 }
  0x19   : > { %p880_p5 = scmp.lt.u32.totalorder %s873_s11, %s1424_s1 }
  0x1a   : > { %p876_p0 = pnand %p1198_p13, %p874_p12 }
  0x1c   : > { %p877_p3 = pneg %p876_p0 }
  0x1e   : > { %p882_p7 = pnand %p880_p5, %p877_p3 }
  0x20   : > { %885 = shalt.err (!%p882_p7)
}
  0x21   : > { %s886_s28 = scalar_lea.vmem %s1175_s29, 128  ;;  %p894_p1 = scmp.lt.s32.totalorder %s1175_s29, %s1175_s29 }
  0x22   : > { %p887_p9 = scmp.ne.s32.totalorder %s1175_s29, %s886_s28  ;;  %p895_p4 = scmp.lt.s32.totalorder %s886_s28, %s886_s28 }
  0x24   : > { %p889_p10 = pnand %p887_p9, %p1198_p13  ;;  %p896_p12 = por %p895_p4, %p894_p1 }
  0x26   : > { %p890_p6 = pneg %p889_p10 }
  0x28   : > { %p897_p0 = pnand %p896_p12, %p890_p6 }
  0x2a   : > { %900 = shalt.err (!%p897_p0)
}
  0x2b   : > { %s1082_s5 = smov 64   ;;  %s1083_s7 = smov 4  }
  0x2c   : > { %778 = dma.hbm_to_vmem [thread:$0]  (!%p1182_p11), %s1424_s1, 128, %s1175_s29, [#allocation9], %s1082_s5, %s1082_s5, %s1083_s7  }
  0x2d   : > { %s901_s13 = scalar_lea.hbm %s1425_s2, 128 }
  0x2e   : > { %p902_p1 = scmp.ne.s32.totalorder %s1425_s2, %s901_s13  ;;  %p908_p10 = scmp.lt.u32.totalorder %s901_s13, %s1425_s2 }
  0x30   : > { %p904_p4 = pnand %p902_p1, %p1198_p13 }
  0x32   : > { %p905_p6 = pneg %p904_p4 }
  0x34   : > { %p910_p3 = pnand %p908_p10, %p905_p6 }
  0x36   : > { %913 = shalt.err (!%p910_p3)
}
  0x37   : > { %s914_s29 = scalar_lea.vmem %s1186_s6, 128  ;;  %p922_p12 = scmp.lt.s32.totalorder %s1186_s6, %s1186_s6 }
  0x38   : > { %p915_p5 = scmp.ne.s32.totalorder %s1186_s6, %s914_s29  ;;  %p923_p0 = scmp.lt.s32.totalorder %s914_s29, %s914_s29 }
  0x3a   : > { %p917_p7 = pnand %p915_p5, %p1198_p13  ;;  %p924_p1 = por %p923_p0, %p922_p12 }
  0x3c   : > { %p918_p9 = pneg %p917_p7 }
  0x3e   : > { %p925_p4 = pnand %p924_p1, %p918_p9 }
  0x40   : > { %928 = shalt.err (!%p925_p4)
}
  0x41   : > { %781 = dma.hbm_to_vmem [thread:$0]  (!%p1182_p11), %s1425_s2, 128, %s1186_s6, [#allocation9], %s1082_s5, %s1082_s5, %s1083_s7  }
  0x42   : > { %s929_s12 = scalar_lea.hbm %s1426_s3, 128 }
  0x43   : > { %p930_p6 = scmp.ne.s32.totalorder %s1426_s3, %s929_s12  ;;  %p936_p5 = scmp.lt.u32.totalorder %s929_s12, %s1426_s3 }
  0x45   : > { %p932_p10 = pnand %p930_p6, %p1198_p13 }
  0x47   : > { %p933_p3 = pneg %p932_p10 }
  0x49   : > { %p938_p7 = pnand %p936_p5, %p933_p3 }
  0x4b   : > { %941 = shalt.err (!%p938_p7)
}
  0x4c   : > { %s942_s29 = scalar_lea.vmem %s203_s8, 128  ;;  %p950_p1 = scmp.lt.s32.totalorder %s203_s8, %s203_s8 }
  0x4d   : > { %p943_p9 = scmp.ne.s32.totalorder %s203_s8, %s942_s29  ;;  %p951_p4 = scmp.lt.s32.totalorder %s942_s29, %s942_s29 }
  0x4f   : > { %p945_p12 = pnand %p943_p9, %p1198_p13  ;;  %p952_p8 = por %p951_p4, %p950_p1 }
  0x51   : > { %p946_p0 = pneg %p945_p12 }
  0x53   : > { %p953_p2 = pnand %p952_p8, %p946_p0 }
  0x55   : > { %956 = shalt.err (!%p953_p2)
}
  0x56   : > { %784 = dma.hbm_to_vmem [thread:$0]  (!%p1182_p11), %s1426_s3, 128, %s203_s8, [#allocation12], %s1082_s5, %s1082_s5, %s1083_s7  }
  0x57   : > { %s41_s14 = sadd.s32 1, %s1065_s17  ;;  %s34_s30 = sadd.s32 1, %s1073_s19 }
  0x58   : > { %p48_p2 = scmp.ne.s32.totalorder %s1065_s17, %s1061_s16  ;;  %p36_p8 = scmp.ge.s32.totalorder %s34_s30, 2 }
  0x59   : > { %p49_p13 = scmp.eq.s32.totalorder %s1077_s20, 0  ;;  %p1441_p6 = scmp.ne.s32.totalorder %s1434_s24, 0 }
  0x5a   : > { %p796_p3 = scmp.lt.s32.totalorder %s1077_s20, 2  ;;  %s1456_s30 = smov (%p36_p8, %s34_s30), 0 }
  0x5b   : > { %p1277_p10 = por %p1441_p6, %p48_p2  ;;  %p50_p5 = por %p49_p13, %p48_p2 }
  0x5c   : > { %s216_s10 = sand.u32 1, %s1065_s17   ;;  %s38_s11 = ssub.s32 %s1073_s19, %s1456_s30 }
  0x5d   : > { %p39_p7 = scmp.eq.s32.totalorder %s38_s11, 0  ;;  %s699_s8 = sshll.u32 %s216_s10, 3 }
  0x5e   : > { %s722_s12 = sshll.u32 %s1073_s19, 7  ;;  %s220_s28 = scalar_lea.vmem [#allocation5], %s699_s8 }
  0x5f   : > { %s1289_s13 = scalar_select %p39_p7, %s1065_s17, %s41_s14  }
  0x60   : > { %s1294_s24 = scalar_lea.hbm %s1423_s0, %s722_s12  ;;  %s227_s29 = sshll.u32 %s220_s28, 4  ;;  %s1296_s29 = int_to_ptr.vmem [resolvable:$true] %s227_s29 }
  0x61   : > { %p1300_p11 = pnand %p796_p3, %p50_p5  ;;  %s1304_s26 = scalar_lea.sflag [#allocation6], %s216_s10 }
  0x62   : > { %s957_s14 = scalar_lea.hbm %s1294_s24, 128  ;;  %s962_s12 = scalar_lea.hbm %s1423_s0, 256 }
  0x63   : > { %p958_p9 = scmp.ne.s32.totalorder %s1294_s24, %s957_s14  ;;  %p959_p12 = pneg %p1300_p11 }
  0x64   : > { %p963_p4 = scmp.lt.u32.totalorder %s1294_s24, %s1423_s0  ;;  %p964_p2 = scmp.lt.u32.totalorder %s962_s12, %s957_s14 }
  0x65   : > { %p960_p0 = pnand %p959_p12, %p958_p9  ;;  %p966_p13 = scmp.lt.u32.totalorder %s957_s14, %s1294_s24 }
  0x66   : > { %p965_p8 = por %p964_p2, %p963_p4 }
  0x67   : > { %p961_p1 = pneg %p960_p0 }
  0x68   : > { %p967_p6 = por %p966_p13, %p965_p8 }
  0x6a   : > { %p968_p3 = pnand %p967_p6, %p961_p1 }
  0x6c   : > { %971 = shalt.err (!%p968_p3)
}
  0x6d   : > { %s972_s10 = scalar_lea.vmem %s1296_s29, 128  ;;  %s1084_s28 = smov [#allocation5]  }
  0x6e   : > { %p973_p5 = scmp.ne.s32.totalorder %s1296_s29, %s972_s10  ;;  %s977_s11 = sshll.u32 %s1084_s28, 4  ;;  %s978_s11 = int_to_ptr.vmem [resolvable:$false] %s977_s11 }
  0x6f   : > { %s979_s8 = scalar_lea.vmem %s978_s11, 256  ;;  %p980_p0 = scmp.lt.s32.totalorder %s1296_s29, %s978_s11 }
  0x70   : > { %p975_p7 = pnand %p973_p5, %p959_p12  ;;  %p981_p4 = scmp.lt.s32.totalorder %s979_s8, %s972_s10 }
  0x72   : > { %p976_p9 = pneg %p975_p7  ;;  %p982_p2 = por %p981_p4, %p980_p0 }
  0x74   : > { %p983_p8 = pnand %p982_p2, %p976_p9 }
  0x76   : > { %986 = shalt.err (!%p983_p8)
}
  0x77   : > { %788 = dma.hbm_to_vmem [thread:$0]  (!%p1300_p11), %s1294_s24, 128, %s1296_s29, %s1304_s26, %s1082_s5, %s1082_s5, %s1083_s7  }
  0x78   : > { %p1444_p12 = scmp.ne.s32.totalorder %s1438_s27, 0 }
  0x79   : > { %s1338_s14 = sand.u32 (!%p1444_p12), 1, %s1061_s16   ;;  %p1445_p1 = scmp.ne.s32.totalorder (!%p1444_p12), %s1435_s25, 0 }
  0x7a   : > { %239 = sbr.rel (%p1444_p12) target bundleno = 1166 (0x48e), region = 36  ;;  %s703_s12 = sshll.u32 (!%p1444_p12), %s1338_s14, 3 }
  0x7b   : > { %s242_s21 = scalar_lea.sflag (!%p1444_p12), [#allocation6], %s1338_s14  ;;  %s245_s6 = scalar_lea.vmem (!%p1444_p12), [#allocation5], %s703_s12 }
  0x81   : > { %1040 = dma.done.wait (%p1445_p1), %s242_s21, 128  }
  0x82   : > { %1042 = vsyncadd (%p1445_p1), %s242_s21, 4294967168  ;;  %p1446_p11 = scmp.ne.s32.totalorder %s1433_s23, 0 }
  0x84   : > { %1044 = dma.done.wait (%p1446_p11), [#allocation9], 256  }
  0x85   : > { %1046 = vsyncadd (%p1446_p11), [#allocation9], 4294967040 }
  0x86   : > { %1048 = dma.done.wait (%p1446_p11), [#allocation12], 128  }
  0x87   : > { %1050 = vsyncadd (%p1446_p11), [#allocation12], 4294967168  ;;  %v1085_v0 = vmov 0.0   ;;  %vm1086_vm0 = vmmov 0   ;;  %v862_v1 = vld [vmem:[#allocation11] sm:$0xff]   ;;  %vm304_vm1 = vcmask 130048  }
  0x88   : > { %747 = vmatprep.subr.bf16.mxu1 %v1085_v0  ;;  %749 = vmatprep.mubr.msk.bf16.mxu1 %vm1086_vm0, %v1085_v0  ;;  %v863_v2 = vld [vmem:[%s245_s6] sm:$0xff]   ;;  %v1087_v3 = vmov 0   ;;  %vm400_vm2 = vcmask 7168   ;;  %s1088_s23 = smov 127   ;;  %v864_v12 = vld [vmem:[#allocation10] sm:$0xff]   ;;  %vm443_vm3 = vcmask 122880  }
  0x89   : > { %741 = vmatprep.subr.bf16.mxu0 %v1085_v0  ;;  %743 = vmatprep.mubr.msk.bf16.mxu0 %vm1086_vm0, %v1085_v0  ;;  %v727_v17 = vld [vmem:[#allocation8] sm:$0xff]   ;;  %s281_s25 = scalar_lea.vmem [#allocation13], %s703_s12  ;;  %s725_s5 = sshll.u32 %s1069_s18, 7 }
  0x8a   : > { %748 = vmatpush3.bf16.msra.mxu1 %v862_v1  ;;  %860 = vset.pattern.permute.xlu1 %v1087_v3  ;;  %v728_v21 = vunpack.c.l.bf16 %v727_v17  ;;  %v729_v23 = vunpack.c.h.bf16 %v727_v17  ;;  %s575_s27 = sshll.u32 %s281_s25, 4  ;;  %s1374_s29 = scalar_lea.hbm %s1427_s4, %s725_s5  ;;  %s1369_s27 = int_to_ptr.vmem [resolvable:$true] %s575_s27 }
  0x8b   : > { %742 = vmatpush3.bf16.msra.mxu0 %v864_v12  ;;  %s560_s26 = scalar_lea.sflag [#allocation7], %s1338_s14  ;;  %s987_s22 = scalar_lea.vmem %s1369_s27, 128 }
  0x8c   : > { %753 = vmatprep.subr.bf16.mxu0 %v1085_v0  ;;  %p988_p13 = scmp.ne.s32.totalorder %s1369_s27, %s987_s22  ;;  %s1089_s18 = smov [#allocation13]  }
  0x8d   : > { %750 = vmatmul.mubr.msk.bf16.vlgmr.msra.gmra.mrb[0].mxu1 %vm304_vm1, %v863_v2  ;;  %s991_s10 = sshll.u32 %s1089_s18, 4  ;;  %s992_s10 = int_to_ptr.vmem [resolvable:$false] %s991_s10 }
  0x8e   : > { %744 = vmatmul.mubr.msk.bf16.vlgmr.msra.gmra.mrb[0].mxu0 %vm304_vm1, %v863_v2  ;;  %p989_p6 = pnand %p988_p13, %p1277_p10  ;;  %s993_s28 = scalar_lea.vmem %s992_s10, 256 }
  0x8f   : > { %755 = vmatprep.mubr.msk.bf16.mxu0 %vm1086_vm0, %v1085_v0  ;;  %p994_p5 = scmp.lt.s32.totalorder %s1369_s27, %s992_s10  ;;  %p995_p7 = scmp.lt.s32.totalorder %s993_s28, %s987_s22 }
  0x90   : > { %p990_p3 = pneg %p989_p6 }
  0x91   : > { %p996_p9 = por %p995_p7, %p994_p5 }
  0x93   : > { %p997_p0 = pnand %p996_p9, %p990_p3 }
 0x160   : > { %v393_v4 = vpop.f32.mrb[0].mxu1 }
 0x161   : > { %401 = vst.msk [vmem:[#allocation3] sm:$0xff] %vm400_vm2, %v393_v4  ;;  %405 = vrot.lane.b32.xlu0 %v393_v4, %s1088_s23  ;;  %v751_v5 = vpop.f32.mrb[1].mxu1  ;;  %v342_v40 = vpop.f32.mrb[0].mxu0 }
 0x162   : > { %v396_v6 = vpop.f32.mrb[2].mxu1  ;;  %v745_v41 = vpop.f32.mrb[1].mxu0 }
 0x163   : > { %402 = vst.msk [vmem:[#allocation3 + $0x8] sm:$0xff] %vm400_vm2, %v396_v6  ;;  %v752_v7 = vpop.f32.mrb[3].mxu1  ;;  %v345_v42 = vpop.f32.mrb[2].mxu0 }
 0x164   : > { %v746_v43 = vpop.f32.mrb[3].mxu0  ;;  %v349_v44 = vpack.c.bf16 %v345_v42, %v342_v40 }
 0x165   : > { %407 = vrot.lane.b32.xlu0 %v396_v6, %s1088_s23 }
 0x166   : > { %754 = vmatpush3.bf16.msra.mxu0 %v349_v44 }
 0x168   : > { %v447_v8 = vld [vmem:[#allocation3] sm:$0xff] }
 0x169   : > { %452 = vperm.xlu1 %860, %v447_v8  }
 0x16a   : > { %v448_v9 = vld [vmem:[#allocation3 + $0x8] sm:$0xff] }
 0x16d   : > { %457 = vperm.xlu1 %860, %v448_v9  }
 0x1d3   : > { %v406_v10 = vpop.permute.xlu0 %405 }
 0x1d4   : > { %411 = vxpose.xlu0.b32.start [1/2] (short) (narrow) %v406_v10, 8 }
 0x1d7   : > { %v408_v11 = vpop.permute.xlu0 %407 }
 0x1d8   : > { %412 = vxpose.xlu0.b32.end [2/2] (short) (narrow) %v408_v11, 8 }
 0x1e8   : > { %v453_v14 = vpop.permute.xlu1 %452 }
 0x1ec   : > { %v458_v15 = vpop.permute.xlu1 %457 }
 0x201   : > { %861 = vset.pattern.permute.xlu0 %v1087_v3 }
 0x254   : > { %v427_v13 = vpop.trf.xlu0 }
 0x255   : > { %444 = vst.msk [vmem:[#allocation4] sm:$0x1] %vm443_vm3, %v427_v13 }
 0x25c   : > { %v713_v16 = vld [vmem:[#allocation4] ss:$0 sm:$0xff] }
 0x25d   : > { %v466_v18 = vadd.f32 %v713_v16, %v453_v14  ;;  %v467_v19 = vadd.f32 %v713_v16, %v458_v15 }
 0x25f   : > { %v468_v20 = vmul.f32 0.2, %v466_v18  ;;  %v469_v22 = vmul.f32 0.2, %v467_v19 }
 0x261   : > { %v470_v24 = vmax.f32 %v466_v18, %v468_v20  ;;  %v471_v25 = vmax.f32 %v467_v19, %v469_v22 }
 0x263   : > { %v476_v26 = vadd.f32 %v728_v21, %v470_v24  ;;  %v477_v27 = vadd.f32 %v729_v23, %v471_v25 }
 0x265   : > { %v479_v28 = vsel %vm304_vm1, %v476_v26, -inf  ;;  %v482_v29 = vsel %vm304_vm1, %v477_v27, -inf }
 0x266   : > { %480 = vmax.xlane.f32.xlu1 %v479_v28  ;;  %483 = vmax.xlane.f32.xlu0 %v482_v29 }
 0x2f3   : > { %v484_v30 = vpop.xlane.xlu0 %483  ;;  %v481_v31 = vpop.xlane.xlu1 %480 }
 0x2f4   : > { %v486_v32 = vsub.f32 %v477_v27, %v484_v30  ;;  %v485_v33 = vsub.f32 %v476_v26, %v481_v31 }
 0x2f6   : > { %v487_v34 = vmul.f32 1.442695, %v485_v33  ;;  %v489_v35 = vmul.f32 1.442695, %v486_v32 }
 0x2f8   : > { %865 = vpow2.f32 %v487_v34 }
 0x2f9   : > { %867 = vpow2.f32 %v489_v35 }
 0x302   : > { %v866_v36 = vpop.eup %865 }
 0x303   : > { %v491_v37 = vsel %vm304_vm1, %v866_v36, 0.0  ;;  %v868_v38 = vpop.eup %867 }
 0x304   : > { %492 = vadd.xlane.f32.xlu1 %v491_v37  ;;  %v494_v39 = vsel %vm304_vm1, %v868_v38, 0.0 }
 0x308   : > { %495 = vadd.xlane.f32.xlu1 %v494_v39 }
 0x391   : > { %v493_v45 = vpop.xlane.xlu1 %492 }
 0x392   : > { %869 = vrcp.f32 %v493_v45 }
 0x395   : > { %v496_v46 = vpop.xlane.xlu1 %495 }
 0x396   : > { %871 = vrcp.f32 %v496_v46 }
 0x39c   : > { %v870_v47 = vpop.eup %869 }
 0x39d   : > { %v499_v49 = vmul.f32 %v870_v47, %v866_v36 }
 0x3a0   : > { %v872_v48 = vpop.eup %871 }
 0x3a1   : > { %v500_v50 = vmul.f32 %v872_v48, %v868_v38 }
 0x3a3   : > { %v501_v51 = vpack.c.bf16 %v500_v50, %v499_v49 }
 0x3a5   : > { %756 = vmatmul.mubr.msk.bf16.vlgmr.msra.gmra.mrb[4].mxu0 %vm304_vm1, %v501_v51 }
 0x478   : > { %v540_v52 = vpop.f32.mrb[4].mxu0 }
 0x479   : > { %v757_v53 = vpop.f32.mrb[5].mxu0  ;;  %v547_v55 = vmax.f32 %v540_v52, 0.0 }
 0x47a   : > { %v543_v54 = vpop.f32.mrb[6].mxu0 }
 0x47b   : > { %v548_v56 = vmax.f32 %v543_v54, 0.0  ;;  %v758_v57 = vpop.f32.mrb[7].mxu0 }
 0x47d   : > { %v733_v58 = vpack.c.bf16 %v548_v56, %v547_v55 }
 0x47f   : > { %734 = vst [vmem:[%s281_s25] sm:$0xff] %v733_v58  }
 0x480   : > { %1000 = shalt.err (!%p997_p0)
}
 0x481   : > { %s1001_s11 = scalar_lea.hbm %s1374_s29, 128  ;;  %s1005_s21 = scalar_lea.hbm %s1427_s4, 256 }
 0x482   : > { %p1002_p4 = scmp.ne.s32.totalorder %s1374_s29, %s1001_s11  ;;  %p1006_p12 = scmp.lt.u32.totalorder %s1374_s29, %s1427_s4 }
 0x483   : > { %p1007_p1 = scmp.lt.u32.totalorder %s1005_s21, %s1001_s11  ;;  %p1009_p13 = scmp.lt.u32.totalorder %s1001_s11, %s1374_s29 }
 0x484   : > { %p1003_p2 = pnand %p1002_p4, %p1277_p10 }
 0x485   : > { %p1008_p11 = por %p1007_p1, %p1006_p12 }
 0x486   : > { %p1004_p8 = pneg %p1003_p2 }
 0x487   : > { %p1010_p6 = por %p1009_p13, %p1008_p11 }
 0x489   : > { %p1011_p3 = pnand %p1010_p6, %p1004_p8 }
 0x48b   : > { %1014 = shalt.err (!%p1011_p3)
}
 0x48c   : > { %s1090_s25 = smov 64   ;;  %s1091_s5 = smov 4  }
 0x48d   : > { %773 = dma.vmem_to_hbm [thread:$0]  (%p1277_p10), %s1369_s27, 128, %s1374_s29, %s560_s26, %s1090_s25, %s1090_s25, %s1091_s5  }
 0x48e PF: > { %s1447_s7 = sld [smem:[#allocation18_spill]]  ;;  %s590_s24 = sand.u32 1, %s1057_s15  }
 0x48f   : > { %p1449_p7 = scmp.ge.s32.totalorder %s1077_s20, 2  ;;  %s591_s22 = scalar_lea.sflag [#allocation7], %s590_s24 }
 0x494   : > { %p1448_p5 = scmp.ne.s32.totalorder %s1447_s7, 0 }
 0x496   : > { %p790_p9 = pnand %p1449_p7, %p1448_p5 }
 0x498   : > { %1052 = dma.done.wait (!%p790_p9), %s591_s22, 128  }
 0x499   : > { %1054 = vsyncadd (!%p790_p9), %s591_s22, 4294967168  ;;  %s22_s20 = sadd.s32 1, %s1077_s20   ;;  %s1450_s15 = smov %s1061_s16 }
 0x49a   : > { %p19_p0 = scmp.ge.s32.totalorder %s22_s20, 4   ;;  %s1451_s16 = smov %s1065_s17 }
 0x49b   : > { %s1452_s17 = smov %s1289_s13  ;;  %s1453_s18 = smov %s1073_s19 }
 0x49c   : > { %s1454_s19 = smov %s1456_s30  ;;  %21 = sbr.rel (!%p19_p0) target bundleno = 8 (0x8), region = 99 }
 0x4a3   :  { %596 = vsyncpa [#allocation6], 1 }
 0x4a4   :  { %598 = vsyncpa [#allocation6 + $0x1], 1 }
 0x4a5   :  { %599 = vsyncpa [#allocation9], 1 }
 0x4a6   :  { %600 = vsyncpa [#allocation12], 1 }
 0x4a7   :  { %601 = vsyncpa [#allocation7], 1 }
 0x4a8   :  { %603 = vsyncpa [#allocation7 + $0x1], 1 }

</bundles_post_ra>
